<compile_context>
chip_gen: v7x
topology: tpu7x:2x2x1
jax: 0.10.0
libtpu: 0.0.40
codegen_flags: <defaults>
</compile_context>

<pallas_src>
import jax
import jax.numpy as jnp
from jax.experimental import pallas as pl
from jax.experimental.pallas import tpu as pltpu


def _round_up(x, m):
    return (x + m - 1) // m * m


def _make_fused_mlp_kernel(n_layers, compute_dtype):
    """Fused [Linear+ReLU]*(n-1) -> Linear+softmax kernel.

    Ref layout: (x_ref, w0, b0, w1, b1, ..., w_{n-1}, b_{n-1}, o_ref).
    Weights arrive in `compute_dtype` (bf16 on the fast path); biases are f32.
    Temperature is pre-folded into the last layer's W/b; padded output columns
    carry a -1e30 bias so exp() underflows to 0 after max subtraction.
    """

    def kernel(*refs):
        x_ref = refs[0]
        o_ref = refs[-1]
        wb_refs = refs[1:-1]

        h = x_ref[...]                                    # (tile_b, d_in)
        for i in range(n_layers):
            w = wb_refs[2 * i][...]                       # (d_in_i, d_out_i) compute_dtype
            b = wb_refs[2 * i + 1][...]                   # (1, d_out_i) f32 -> broadcast
            y = jnp.dot(h.astype(compute_dtype), w,
                        preferred_element_type=jnp.float32) + b
            if i < n_layers - 1:
                h = jnp.maximum(y, 0.0)                   # ReLU in f32
            else:
                # temperature already folded into w/b; max-subtracted softmax
                m = jnp.max(y, axis=-1, keepdims=True)
                e = jnp.exp(y - m)
                denom = jnp.sum(e, axis=-1, keepdims=True)
                h = e / denom                             # exact divide: rows sum to 1
        o_ref[...] = h.astype(o_ref.dtype)

    return kernel


def simple_nn_forward(x, params, temperature, *, batch_tile=512,
                      feature_pad=128, use_bf16=True):
    """Fused Pallas forward for SimpleNN.

    x: (B, D_in) f32; params: list of (W (d_in, d_out), b (d_out,)).
    Hidden layers: Linear + ReLU.  Last layer: Linear + softmax(logits / T).
    """
    n_layers = len(params)
    batch, d_in = x.shape
    d_out = params[-1][0].shape[1]
    out_dtype = jnp.float32
    compute_dtype = jnp.bfloat16 if use_bf16 else jnp.float32

    # --- param prep: pad every layer's OUTPUT width to a multiple of `feature_pad`
    #     (zeros for hidden layers, -1e30 bias for the final padded columns), fold
    #     1/T into the last layer, cast weights to the MXU compute dtype.
    inv_t = jnp.float32(1.0 / float(temperature))
    flat_inputs = []
    in_dim = d_in                       # input width stays unpadded (full-dim block is legal)
    for i, (w, b) in enumerate(params):
        w = w.astype(jnp.float32)
        b = b.astype(jnp.float32)
        di, do = w.shape
        if i == n_layers - 1:
            w = w * inv_t               # fold temperature BEFORE padding
            b = b * inv_t
        do_pad = _round_up(do, feature_pad)
        row_pad = in_dim - di           # previous layer's padded width (zeros contribute 0)
        col_pad = do_pad - do
        if row_pad or col_pad:
            w = jnp.pad(w, ((0, row_pad), (0, col_pad)))
        if col_pad:
            if i == n_layers - 1:
                b = jnp.concatenate(
                    [b, jnp.full((col_pad,), -1e30, jnp.float32)])
            else:
                b = jnp.pad(b, (0, col_pad))   # ReLU(0 + 0) = 0 propagates exactly
        flat_inputs += [w.astype(compute_dtype), b.reshape(1, -1)]  # bias stays f32
        in_dim = do_pad
    d_out_pad = in_dim

    # --- batch tiling: no host pad of x when a single full-dim tile suffices;
    #     otherwise largest sublane-aligned tile <= batch_tile (>=2 grid steps when
    #     the batch allows it -> both v7x TensorCores via the "parallel" axis).
    x_in = x.astype(compute_dtype)
    sublane = 16 if use_bf16 else 8
    if batch <= batch_tile:
        tile_b = batch                  # single tile equal to the full batch dim
        padded_b = batch
    else:
        tile_b = _round_up(min(batch_tile, batch), sublane)
        padded_b = _round_up(batch, tile_b)
        if padded_b != batch:
            x_in = jnp.pad(x_in, ((0, padded_b - batch), (0, 0)))
    grid = (padded_b // tile_b,)

    in_specs = [pl.BlockSpec((tile_b, d_in), lambda i: (i, 0))]
    for arr in flat_inputs:
        # whole weight/bias resident in VMEM across the batch grid
        in_specs.append(pl.BlockSpec(arr.shape, lambda i: (0, 0)))
    out_specs = pl.BlockSpec((tile_b, d_out_pad), lambda i: (i, 0))

    out_padded = pl.pallas_call(
        _make_fused_mlp_kernel(n_layers, compute_dtype),
        out_shape=jax.ShapeDtypeStruct((padded_b, d_out_pad), out_dtype),
        grid=grid,
        in_specs=in_specs,
        out_specs=out_specs,
        compiler_params=pltpu.CompilerParams(
            dimension_semantics=("parallel",),
            vmem_limit_bytes=32 * 1024 * 1024,
        ),
    )(x_in, *flat_inputs)

    return out_padded[:batch, :d_out]


def init_simple_nn_params(key, layer_sizes):
    """Deterministic parameter init (PyTorch-Linear-like uniform bounds)."""
    params = []
    for l in range(len(layer_sizes) - 1):
        d_in, d_out = layer_sizes[l], layer_sizes[l + 1]
        key, kw, kb = jax.random.split(key, 3)
        bound = 1.0 / (d_in ** 0.5)
        # stored already transposed: (in, out)
        w = jax.random.uniform(kw, (d_in, d_out), jnp.float32, -bound, bound)
        b = jax.random.uniform(kb, (d_out,), jnp.float32, -bound, bound)
        params.append((w, b))
    return params


def simple_nn_reference(x, params, temperature):
    """Pure-JAX f32 reference matching the PyTorch module semantics."""
    n_layers = len(params)
    for i, (w, b) in enumerate(params):
        y = x @ w + b
        if i < n_layers - 1:
            x = jnp.maximum(y, 0.0)
        else:
            x = jax.nn.softmax(y / temperature, axis=-1)
    return x


if __name__ == "__main__":
    layer_sizes = (32, 64, 48, 10)   # SimpleNN(layer_sizes=[32, 64, 48, 10])
    temperature = 2.0
    batch = 8

    key = jax.random.PRNGKey(0)
    key, kx = jax.random.split(key)
    x = jax.random.normal(kx, (batch, layer_sizes[0]), jnp.float32)

    params = init_simple_nn_params(key, layer_sizes)
    ref = simple_nn_reference(x, params, temperature)

    # Fast path: bf16 MXU feed, f32 accumulation / softmax.
    out = simple_nn_forward(x, params, temperature, use_bf16=True)
    out = jax.block_until_ready(out)
    assert out.shape == (batch, layer_sizes[-1])
    # exact divide -> rows of the softmax sum to 1 within f32 rounding
    assert jnp.allclose(jnp.sum(out, axis=-1), 1.0, atol=1e-5)
    # bf16 matmul tolerance on probabilities
    assert float(jnp.max(jnp.abs(out - ref))) < 2e-2

    # Exact f32 path: must match the pure-JAX reference tightly (validates the
    # feature padding / temperature folding / padded-column bias logic).
    out_f32 = simple_nn_forward(x, params, temperature, use_bf16=False)
    out_f32 = jax.block_until_ready(out_f32)
    assert jnp.allclose(jnp.sum(out_f32, axis=-1), 1.0, atol=1e-5)
    assert jnp.allclose(out_f32, ref, atol=1e-5, rtol=1e-5)

    print("KERNEL_OK")
</pallas_src>

<mosaic_0001>
module attributes {stable_mosaic.version = 11 : i64} {
  func.func @kernel(%arg0: i32, %arg1: memref<8x32xbf16, #tpu.memory_space<vmem>>, %arg2: memref<32x128xbf16, #tpu.memory_space<vmem>>, %arg3: memref<1x128xf32, #tpu.memory_space<vmem>>, %arg4: memref<128x128xbf16, #tpu.memory_space<vmem>>, %arg5: memref<1x128xf32, #tpu.memory_space<vmem>>, %arg6: memref<128x128xbf16, #tpu.memory_space<vmem>>, %arg7: memref<1x128xf32, #tpu.memory_space<vmem>>, %arg8: memref<8x128xf32, #tpu.memory_space<vmem>>) attributes {dimension_semantics = [#tpu.dimension_semantics<parallel>], iteration_bounds = array<i64: 1>, scalar_prefetch = 0 : i64, scratch_operands = 0 : i64, tpu.core_type = #tpu.core_type<tc>, window_params = [{transform_indices = @transform_0, window_bounds = array<i64: 8, 32>}, {pipeline_mode = #tpu.pipeline_mode<synchronous>, transform_indices = @transform_1, window_bounds = array<i64: 32, 128>}, {pipeline_mode = #tpu.pipeline_mode<synchronous>, transform_indices = @transform_2, window_bounds = array<i64: 1, 128>}, {pipeline_mode = #tpu.pipeline_mode<synchronous>, transform_indices = @transform_3, window_bounds = array<i64: 128, 128>}, {pipeline_mode = #tpu.pipeline_mode<synchronous>, transform_indices = @transform_4, window_bounds = array<i64: 1, 128>}, {pipeline_mode = #tpu.pipeline_mode<synchronous>, transform_indices = @transform_5, window_bounds = array<i64: 128, 128>}, {pipeline_mode = #tpu.pipeline_mode<synchronous>, transform_indices = @transform_6, window_bounds = array<i64: 1, 128>}, {transform_indices = @transform_7, window_bounds = array<i64: 8, 128>}]} {
    %c0 = arith.constant 0 : index
    %c0_0 = arith.constant 0 : index
    %0 = vector.load %arg1[%c0, %c0_0] : memref<8x32xbf16, #tpu.memory_space<vmem>>, vector<8x32xbf16>
    %c0_1 = arith.constant 0 : index
    %c0_2 = arith.constant 0 : index
    %1 = vector.load %arg2[%c0_1, %c0_2] : memref<32x128xbf16, #tpu.memory_space<vmem>>, vector<32x128xbf16>
    %c0_3 = arith.constant 0 : index
    %c0_4 = arith.constant 0 : index
    %2 = vector.load %arg3[%c0_3, %c0_4] : memref<1x128xf32, #tpu.memory_space<vmem>>, vector<1x128xf32>
    %cst = arith.constant dense<0.000000e+00> : vector<8x128xf32>
    %3 = tpu.matmul %0, %1, %cst {dimension_numbers = #tpu.dot_dimension_numbers<[1], [0], [0], [1], [0, 0, 1, 1], [], []>} : vector<8x32xbf16>, vector<32x128xbf16>, vector<8x128xf32> -> vector<8x128xf32>
    %4 = vector.broadcast %2 : vector<1x128xf32> to vector<8x128xf32>
    %5 = arith.addf %3, %4 : vector<8x128xf32>
    %cst_5 = arith.constant 0.000000e+00 : f32
    %6 = vector.broadcast %cst_5 : f32 to vector<8x128xf32>
    %7 = arith.maximumf %5, %6 : vector<8x128xf32>
    %c0_6 = arith.constant 0 : index
    %c0_7 = arith.constant 0 : index
    %8 = vector.load %arg4[%c0_6, %c0_7] : memref<128x128xbf16, #tpu.memory_space<vmem>>, vector<128x128xbf16>
    %c0_8 = arith.constant 0 : index
    %c0_9 = arith.constant 0 : index
    %9 = vector.load %arg5[%c0_8, %c0_9] : memref<1x128xf32, #tpu.memory_space<vmem>>, vector<1x128xf32>
    %10 = arith.truncf %7 : vector<8x128xf32> to vector<8x128xbf16>
    %cst_10 = arith.constant dense<0.000000e+00> : vector<8x128xf32>
    %11 = tpu.matmul %10, %8, %cst_10 {dimension_numbers = #tpu.dot_dimension_numbers<[1], [0], [0], [1], [0, 0, 1, 1], [], []>} : vector<8x128xbf16>, vector<128x128xbf16>, vector<8x128xf32> -> vector<8x128xf32>
    %12 = vector.broadcast %9 : vector<1x128xf32> to vector<8x128xf32>
    %13 = arith.addf %11, %12 : vector<8x128xf32>
    %cst_11 = arith.constant 0.000000e+00 : f32
    %14 = vector.broadcast %cst_11 : f32 to vector<8x128xf32>
    %15 = arith.maximumf %13, %14 : vector<8x128xf32>
    %c0_12 = arith.constant 0 : index
    %c0_13 = arith.constant 0 : index
    %16 = vector.load %arg6[%c0_12, %c0_13] : memref<128x128xbf16, #tpu.memory_space<vmem>>, vector<128x128xbf16>
    %c0_14 = arith.constant 0 : index
    %c0_15 = arith.constant 0 : index
    %17 = vector.load %arg7[%c0_14, %c0_15] : memref<1x128xf32, #tpu.memory_space<vmem>>, vector<1x128xf32>
    %18 = arith.truncf %15 : vector<8x128xf32> to vector<8x128xbf16>
    %cst_16 = arith.constant dense<0.000000e+00> : vector<8x128xf32>
    %19 = tpu.matmul %18, %16, %cst_16 {dimension_numbers = #tpu.dot_dimension_numbers<[1], [0], [0], [1], [0, 0, 1, 1], [], []>} : vector<8x128xbf16>, vector<128x128xbf16>, vector<8x128xf32> -> vector<8x128xf32>
    %20 = vector.broadcast %17 : vector<1x128xf32> to vector<8x128xf32>
    %21 = arith.addf %19, %20 : vector<8x128xf32>
    %cst_17 = arith.constant dense<0xFF800000> : vector<8xf32>
    %22 = vector.multi_reduction <maximumf>, %21, %cst_17 [1] : vector<8x128xf32> to vector<8xf32>
    %23 = vector.shape_cast %22 : vector<8xf32> to vector<8x1xf32>
    %24 = vector.broadcast %23 : vector<8x1xf32> to vector<8x128xf32>
    %25 = arith.subf %21, %24 : vector<8x128xf32>
    %26 = math.exp %25 : vector<8x128xf32>
    %cst_18 = arith.constant dense<0.000000e+00> : vector<8xf32>
    %27 = vector.multi_reduction <add>, %26, %cst_18 [1] : vector<8x128xf32> to vector<8xf32>
    %28 = vector.shape_cast %27 : vector<8xf32> to vector<8x1xf32>
    %29 = vector.broadcast %28 : vector<8x1xf32> to vector<8x128xf32>
    %30 = arith.divf %26, %29 : vector<8x128xf32>
    %c0_19 = arith.constant 0 : index
    %c0_20 = arith.constant 0 : index
    %31 = vector.load %arg8[%c0_19, %c0_20] : memref<8x128xf32, #tpu.memory_space<vmem>>, vector<8x128xf32>
    tpu.vector_store %arg8[%c0_19, %c0_20], %30 {strides = array<i32>} : memref<8x128xf32, #tpu.memory_space<vmem>>, vector<8x128xf32>,
    return
  }
  func.func @transform_0(%arg0: i32) -> (i32, i32) {
    %c0_i32 = arith.constant 0 : i32
    %c0_i32_0 = arith.constant 0 : i32
    return %arg0, %c0_i32 : i32, i32
  }
  func.func @transform_1(%arg0: i32) -> (i32, i32) {
    %c0_i32 = arith.constant 0 : i32
    %c0_i32_0 = arith.constant 0 : i32
    %c0_i32_1 = arith.constant 0 : i32
    return %c0_i32, %c0_i32_0 : i32, i32
  }
  func.func @transform_2(%arg0: i32) -> (i32, i32) {
    %c0_i32 = arith.constant 0 : i32
    %c0_i32_0 = arith.constant 0 : i32
    %c0_i32_1 = arith.constant 0 : i32
    return %c0_i32, %c0_i32_0 : i32, i32
  }
  func.func @transform_3(%arg0: i32) -> (i32, i32) {
    %c0_i32 = arith.constant 0 : i32
    %c0_i32_0 = arith.constant 0 : i32
    %c0_i32_1 = arith.constant 0 : i32
    return %c0_i32, %c0_i32_0 : i32, i32
  }
  func.func @transform_4(%arg0: i32) -> (i32, i32) {
    %c0_i32 = arith.constant 0 : i32
    %c0_i32_0 = arith.constant 0 : i32
    %c0_i32_1 = arith.constant 0 : i32
    return %c0_i32, %c0_i32_0 : i32, i32
  }
  func.func @transform_5(%arg0: i32) -> (i32, i32) {
    %c0_i32 = arith.constant 0 : i32
    %c0_i32_0 = arith.constant 0 : i32
    %c0_i32_1 = arith.constant 0 : i32
    return %c0_i32, %c0_i32_0 : i32, i32
  }
  func.func @transform_6(%arg0: i32) -> (i32, i32) {
    %c0_i32 = arith.constant 0 : i32
    %c0_i32_0 = arith.constant 0 : i32
    %c0_i32_1 = arith.constant 0 : i32
    return %c0_i32, %c0_i32_0 : i32, i32
  }
  func.func @transform_7(%arg0: i32) -> (i32, i32) {
    %c0_i32 = arith.constant 0 : i32
    %c0_i32_0 = arith.constant 0 : i32
    return %arg0, %c0_i32 : i32, i32
  }
}

</mosaic_0001>

<bundles_post_ra>
// kernel: tpu_custom_call.1
= control target key start
LH: loop header
LB: loop body
LE: loop exit
PB: predicated region body
PF: predicated region fallthrough
CT: control target
= control target key end

     0   :  { %12 = vsyncpa [#allocation3], 0  ;;  %s793_s0 = inlined_call_operand.hbm [shape: bf16[8,32], index: 0, kind: input, shape index: {}]   ;;  %s794_s1 = inlined_call_operand.hbm [shape: bf16[32,128], index: 1, kind: input, shape index: {}]   ;;  %s795_s2 = inlined_call_operand.vmem [shape: f32[1,128], index: 2, kind: input, shape index: {}]   ;;  %s796_s3 = inlined_call_operand.hbm [shape: bf16[128,128], index: 3, kind: input, shape index: {}]   ;;  %s797_s4 = inlined_call_operand.vmem [shape: f32[1,128], index: 4, kind: input, shape index: {}]   ;;  %s798_s5 = inlined_call_operand.hbm [shape: bf16[128,128], index: 5, kind: input, shape index: {}]   ;;  %s799_s6 = inlined_call_operand.vmem [shape: f32[1,128], index: 6, kind: input, shape index: {}]   ;;  %s800_s7 = inlined_call_operand.hbm [shape: f32[8,128], index: 7, kind: output, shape index: {}]  }
   0x1   :  { %13 = vsyncpa [#allocation6], 0 }
   0x2   :  { %14 = vsyncpa [#allocation9], 0 }
   0x3   :  { %15 = vsyncpa [#allocation4], 0  ;;  %s642_s24 = smov [#allocation5]   ;;  %s524_s28 = scalar_lea.hbm %s794_s1, 256 }
   0x4   :  { %s31_s25 = sshll.u32 %s642_s24, 4  ;;  %p525_p0 = scmp.ne.s32.totalorder %s794_s1, %s524_s28  ;;  %s32_s25 = int_to_ptr.vmem [resolvable:$true] %s31_s25 }
   0x5   :  { %p528_p1 = scmp.lt.u32.totalorder %s524_s28, %s794_s1 }
   0x7   :  { %p530_p2 = pnand %p528_p1, %p525_p0 }
   0x9   :  { %533 = shalt.err (!%p530_p2)
}
   0xa   :  { %s534_s10 = scalar_lea.vmem %s32_s25, 256  ;;  %p539_p4 = scmp.lt.s32.totalorder %s32_s25, %s32_s25 }
   0xb   :  { %p535_p3 = scmp.ne.s32.totalorder %s32_s25, %s534_s10  ;;  %p540_p5 = scmp.lt.s32.totalorder %s534_s10, %s534_s10 }
   0xd   :  { %p541_p6 = por %p540_p5, %p539_p4 }
   0xf   :  { %p542_p7 = pnand %p541_p6, %p535_p3 }
  0x11   :  { %545 = shalt.err (!%p542_p7)
}
  0x12   :  { %s643_s11 = smov 64   ;;  %s644_s12 = smov 4  }
  0x13   :  { %37 = dma.hbm_to_vmem [thread:$0]  %s794_s1, 256, %s32_s25, [#allocation6], %s643_s11, %s643_s11, %s644_s12  }
  0x14   :  { %s645_s15 = smov [#allocation2]   ;;  %s646_s17 = smov [#allocation7]  }
  0x15   :  { %s22_s16 = sshll.u32 %s645_s15, 4  ;;  %s45_s18 = sshll.u32 %s646_s17, 4  ;;  %s23_s16 = int_to_ptr.vmem [resolvable:$true] %s22_s16  ;;  %s46_s18 = int_to_ptr.vmem [resolvable:$true] %s45_s18 }
  0x16   :  { %s546_s21 = scalar_lea.hbm %s793_s0, 64 }
  0x17   :  { %p547_p8 = scmp.ne.s32.totalorder %s793_s0, %s546_s21  ;;  %p550_p9 = scmp.lt.u32.totalorder %s546_s21, %s793_s0 }
  0x19   :  { %p552_p10 = pnand %p550_p9, %p547_p8 }
  0x1b   :  { %555 = shalt.err (!%p552_p10)
}
  0x1c   :  { %s556_s1 = scalar_lea.vmem %s23_s16, 64  ;;  %p561_p12 = scmp.lt.s32.totalorder %s23_s16, %s23_s16 }
  0x1d   :  { %p557_p11 = scmp.ne.s32.totalorder %s23_s16, %s556_s1  ;;  %p562_p13 = scmp.lt.s32.totalorder %s556_s1, %s556_s1 }
  0x1f   :  { %p563_p0 = por %p562_p13, %p561_p12 }
  0x21   :  { %p564_p1 = pnand %p563_p0, %p557_p11 }
  0x23   :  { %567 = shalt.err (!%p564_p1)
}
  0x24   :  { %25 = dma.hbm_to_vmem [thread:$0]  %s793_s0, 64, %s23_s16, [#allocation3]  }
  0x25   :  { %s568_s30 = scalar_lea.hbm %s796_s3, 1024 }
  0x26   :  { %p569_p2 = scmp.ne.s32.totalorder %s796_s3, %s568_s30  ;;  %p572_p3 = scmp.lt.u32.totalorder %s568_s30, %s796_s3 }
  0x28   :  { %p574_p4 = pnand %p572_p3, %p569_p2 }
  0x2a   :  { %577 = shalt.err (!%p574_p4)
}
  0x2b   :  { %s578_s14 = scalar_lea.vmem %s46_s18, 1024  ;;  %p583_p6 = scmp.lt.s32.totalorder %s46_s18, %s46_s18 }
  0x2c   :  { %p579_p5 = scmp.ne.s32.totalorder %s46_s18, %s578_s14  ;;  %p584_p7 = scmp.lt.s32.totalorder %s578_s14, %s578_s14 }
  0x2e   :  { %p585_p8 = por %p584_p7, %p583_p6 }
  0x30   :  { %p586_p9 = pnand %p585_p8, %p579_p5 }
  0x32   :  { %589 = shalt.err (!%p586_p9)
}
  0x33   :  { %51 = dma.hbm_to_vmem [thread:$0]  %s796_s3, 1024, %s46_s18, [#allocation6], %s643_s11, %s643_s11, %s644_s12  }
  0x34   :  { %s647_s16 = smov [#allocation8]   ;;  %s590_s21 = scalar_lea.hbm %s798_s5, 1024 }
  0x35   :  { %s59_s17 = sshll.u32 %s647_s16, 4  ;;  %p591_p10 = scmp.ne.s32.totalorder %s798_s5, %s590_s21  ;;  %s60_s17 = int_to_ptr.vmem [resolvable:$true] %s59_s17 }
  0x36   :  { %p594_p11 = scmp.lt.u32.totalorder %s590_s21, %s798_s5 }
  0x38   :  { %p596_p12 = pnand %p594_p11, %p591_p10 }
  0x3a   :  { %599 = shalt.err (!%p596_p12)
}
  0x3b   :  { %s600_s1 = scalar_lea.vmem %s60_s17, 1024  ;;  %p605_p0 = scmp.lt.s32.totalorder %s60_s17, %s60_s17 }
  0x3c   :  { %p601_p13 = scmp.ne.s32.totalorder %s60_s17, %s600_s1  ;;  %p606_p1 = scmp.lt.s32.totalorder %s600_s1, %s600_s1 }
  0x3e   :  { %p607_p2 = por %p606_p1, %p605_p0 }
  0x40   :  { %p608_p3 = pnand %p607_p2, %p601_p13 }
  0x42   :  { %611 = shalt.err (!%p608_p3)
}
  0x43   :  { %65 = dma.hbm_to_vmem [thread:$0]  %s798_s5, 1024, %s60_s17, [#allocation9], %s643_s11, %s643_s11, %s644_s12  }
  0x44   :  { %634 = dma.done.wait [#allocation3], 64  }
  0x45   :  { %635 = vsyncadd [#allocation3], 4294967232 }
  0x46   :  { %636 = dma.done.wait [#allocation6], 1280  }
  0x47   :  { %637 = vsyncadd [#allocation6], 4294966016 }
  0x48   :  { %638 = dma.done.wait [#allocation9], 1024  }
  0x49   :  { %639 = vsyncadd [#allocation9], 4294966272  ;;  %v648_v0 = vmov 0.0   ;;  %vm649_vm0 = vmmov 0   ;;  %v502_v1 = vld [vmem:[#allocation5] sm:$0xff]   ;;  %v503_v2 = vld [vmem:[#allocation5 + $0x8] sm:$0xff]  }
  0x4a   :  { %445 = vmatprep.subr.bf16.mxu0 %v648_v0  ;;  %449 = vmatprep.mubr.msk.bf16.mxu0 %vm649_vm0, %v648_v0  ;;  %v504_v3 = vld [vmem:[#allocation7] sm:$0xff]   ;;  %vm105_vm1 = vcmask 261120   ;;  %v505_v4 = vld [vmem:[#allocation7 + $0x8] sm:$0xff]   ;;  %v506_v6 = vld [vmem:[#allocation7 + $0x10] sm:$0xff]  }
  0x4b   :  { %453 = vmatprep.subr.bf16.mxu1 %v648_v0  ;;  %469 = vmatprep.mubr.msk.bf16.mxu1 %vm649_vm0, %v648_v0  ;;  %v81_v5 = vld [vmem:[#allocation2] sm:$0xf]  ;;  %v507_v7 = vld [vmem:[#allocation7 + $0x18] sm:$0xff]   ;;  %v508_v8 = vld [vmem:[#allocation7 + $0x20] sm:$0xff]  }
  0x4c   :  { %446 = vmatpush3.bf16.msra.mxu0 %v502_v1  ;;  %454 = vmatpush3.bf16.msra.mxu1 %v504_v3  ;;  %v509_v9 = vld [vmem:[#allocation7 + $0x28] sm:$0xff]   ;;  %v510_v10 = vld [vmem:[#allocation7 + $0x30] sm:$0xff]   ;;  %v511_v11 = vld [vmem:[#allocation7 + $0x38] sm:$0xff]  }
  0x4d   :  { %447 = vmatprep.subr.bf16.mxu0 %v648_v0  ;;  %455 = vmatprep.subr.bf16.mxu1 %v648_v0  ;;  %v512_v12 = vld [vmem:[#allocation8] sm:$0xff]   ;;  %v513_v13 = vld [vmem:[#allocation8 + $0x8] sm:$0xff]   ;;  %v514_v14 = vld [vmem:[#allocation8 + $0x10] sm:$0xff]  }
  0x4e   :  { %v515_v15 = vld [vmem:[#allocation8 + $0x18] sm:$0xff]   ;;  %v516_v16 = vld [vmem:[#allocation8 + $0x20] sm:$0xff]   ;;  %v517_v17 = vld [vmem:[#allocation8 + $0x28] sm:$0xff]  }
  0x4f   :  { %v402_v18 = vld [vmem:[%s795_s2] ss:$0 sm:$0xff]  ;;  %v518_v26 = vld [vmem:[#allocation8 + $0x30] sm:$0xff]   ;;  %v519_v27 = vld [vmem:[#allocation8 + $0x38] sm:$0xff]  }
  0x50   :  { %448 = vmatpush3.bf16.msra.mxu0 %v503_v2  ;;  %456 = vmatpush3.bf16.msra.mxu1 %v505_v4  ;;  %v406_v28 = vld [vmem:[%s797_s4] ss:$0 sm:$0xff]  ;;  %s650_s4 = smov [#allocation10]  }
  0x51   :  { %473 = vmatprep.subr.bf16.mxu0 %v648_v0  ;;  %457 = vmatprep.subr.bf16.mxu1 %v648_v0  ;;  %v415_v36 = vld [vmem:[%s799_s6] ss:$0 sm:$0xff]  ;;  %s391_s28 = sshll.u32 %s650_s4, 4  ;;  %s392_s28 = int_to_ptr.vmem [resolvable:$true] %s391_s28 }
  0x52   :  { %s612_s6 = scalar_lea.vmem %s392_s28, 128  ;;  %p617_p5 = scmp.lt.s32.totalorder %s392_s28, %s392_s28 }
  0x53   :  { %450 = vmatmul.mubr.msk.bf16.vlgmr.msra.gmra.mrb[0].mxu0 %vm105_vm1, %v81_v5  ;;  %p613_p4 = scmp.ne.s32.totalorder %s392_s28, %s612_s6  ;;  %p618_p6 = scmp.lt.s32.totalorder %s612_s6, %s612_s6 }
  0x54   :  { %489 = vmatprep.mubr.msk.bf16.mxu0 %vm649_vm0, %v648_v0  ;;  %458 = vmatpush3.bf16.msra.mxu1 %v506_v6 }
  0x55   :  { %459 = vmatprep.subr.bf16.mxu1 %v648_v0  ;;  %474 = vmatpush3.bf16.msra.mxu0 %v512_v12  ;;  %p619_p7 = por %p618_p6, %p617_p5 }
  0x56   :  { %475 = vmatprep.subr.bf16.mxu0 %v648_v0 }
  0x57   :  { %p620_p8 = pnand %p619_p7, %p613_p4 }
  0x58   :  { %460 = vmatpush3.bf16.msra.mxu1 %v507_v7 }
  0x59   :  { %461 = vmatprep.subr.bf16.mxu1 %v648_v0  ;;  %476 = vmatpush3.bf16.msra.mxu0 %v513_v13 }
  0x5a   :  { %477 = vmatprep.subr.bf16.mxu0 %v648_v0 }
  0x5c   :  { %462 = vmatpush3.bf16.msra.mxu1 %v508_v8 }
  0x5d   :  { %463 = vmatprep.subr.bf16.mxu1 %v648_v0  ;;  %478 = vmatpush3.bf16.msra.mxu0 %v514_v14 }
  0x5e   :  { %479 = vmatprep.subr.bf16.mxu0 %v648_v0 }
  0x60   :  { %464 = vmatpush3.bf16.msra.mxu1 %v509_v9 }
  0x61   :  { %465 = vmatprep.subr.bf16.mxu1 %v648_v0  ;;  %480 = vmatpush3.bf16.msra.mxu0 %v515_v15 }
  0x62   :  { %481 = vmatprep.subr.bf16.mxu0 %v648_v0 }
  0x64   :  { %466 = vmatpush3.bf16.msra.mxu1 %v510_v10 }
  0x65   :  { %467 = vmatprep.subr.bf16.mxu1 %v648_v0  ;;  %482 = vmatpush3.bf16.msra.mxu0 %v516_v16 }
  0x66   :  { %483 = vmatprep.subr.bf16.mxu0 %v648_v0 }
  0x68   :  { %468 = vmatpush3.bf16.msra.mxu1 %v511_v11 }
  0x69   :  { %484 = vmatpush3.bf16.msra.mxu0 %v517_v17 }
  0x6a   :  { %485 = vmatprep.subr.bf16.mxu0 %v648_v0 }
  0x6d   :  { %486 = vmatpush3.bf16.msra.mxu0 %v518_v26 }
  0x6e   :  { %487 = vmatprep.subr.bf16.mxu0 %v648_v0 }
  0x71   :  { %488 = vmatpush3.bf16.msra.mxu0 %v519_v27 }
 0x126   :  { %v143_v19 = vpop.f32.mrb[0].mxu0 }
 0x127   :  { %v144_v20 = vadd.f32 %v402_v18, %v143_v19  ;;  %v451_v21 = vpop.f32.mrb[1].mxu0 }
 0x128   :  { %v146_v22 = vpop.f32.mrb[2].mxu0 }
 0x129   :  { %v149_v23 = vmax.f32 %v144_v20, 0.0  ;;  %v452_v24 = vpop.f32.mrb[3].mxu0 }
 0x12b   :  { %v167_v25 = vpack.c.bf16 %v149_v23, %v149_v23 }
 0x12d   :  { %470 = vmatmul.mubr.bf16.vlgmr.msra.gmra.mrb[0].mxu1 %v167_v25 }
 0x200   :  { %v256_v29 = vpop.f32.mrb[0].mxu1 }
 0x201   :  { %v257_v30 = vadd.f32 %v406_v28, %v256_v29  ;;  %v471_v31 = vpop.f32.mrb[1].mxu1 }
 0x202   :  { %v259_v32 = vpop.f32.mrb[2].mxu1 }
 0x203   :  { %v262_v33 = vmax.f32 %v257_v30, 0.0  ;;  %v472_v34 = vpop.f32.mrb[3].mxu1 }
 0x205   :  { %v280_v35 = vpack.c.bf16 %v262_v33, %v262_v33 }
 0x207   :  { %490 = vmatmul.mubr.bf16.vlgmr.msra.gmra.mrb[4].mxu0 %v280_v35 }
 0x2da   :  { %v369_v37 = vpop.f32.mrb[4].mxu0 }
 0x2db   :  { %v370_v38 = vadd.f32 %v415_v36, %v369_v37  ;;  %v491_v39 = vpop.f32.mrb[5].mxu0 }
 0x2dc   :  { %v372_v40 = vpop.f32.mrb[6].mxu0 }
 0x2dd   :  { %375 = vmax.xlane.f32.xlu0 %v370_v38  ;;  %v492_v41 = vpop.f32.mrb[7].mxu0 }
 0x36a   :  { %v376_v42 = vpop.xlane.xlu0 %375 }
 0x36b   :  { %v377_v43 = vsub.f32 %v370_v38, %v376_v42 }
 0x36d   :  { %v378_v44 = vmul.f32 1.442695, %v377_v43 }
 0x36f   :  { %520 = vpow2.f32 %v378_v44 }
 0x379   :  { %v521_v45 = vpop.eup %520 }
 0x37a   :  { %380 = vadd.xlane.f32.xlu0 %v521_v45 }
 0x407   :  { %v381_v46 = vpop.xlane.xlu0 %380 }
 0x408   :  { %522 = vrcp.f32 %v381_v46 }
 0x412   :  { %v523_v47 = vpop.eup %522 }
 0x413   :  { %v383_v48 = vmul.f32 %v523_v47, %v521_v45 }
 0x415   :  { %384 = vst [vmem:[#allocation10] sm:$0xff] %v383_v48 }
 0x416   :  { %623 = shalt.err (!%p620_p8)
}
 0x417   :  { %s624_s8 = scalar_lea.hbm %s800_s7, 128 }
 0x418   :  { %p625_p9 = scmp.ne.s32.totalorder %s800_s7, %s624_s8  ;;  %p628_p10 = scmp.lt.u32.totalorder %s624_s8, %s800_s7 }
 0x41a   :  { %p630_p11 = pnand %p628_p10, %p625_p9 }
 0x41c   :  { %633 = shalt.err (!%p630_p11)
}
 0x41d   :  { %394 = dma.vmem_to_hbm [thread:$0]  %s392_s28, 128, %s800_s7, [#allocation4]  }
 0x41e   :  { %640 = dma.done.wait [#allocation4], 128  }
 0x41f   :  { %641 = vsyncadd [#allocation4], 4294967168 }
 0x420   :  { %398 = vsyncpa [#allocation3], 1 }
 0x421   :  { %399 = vsyncpa [#allocation6], 1 }
 0x422   :  { %400 = vsyncpa [#allocation9], 1 }
 0x423   :  { %401 = vsyncpa [#allocation4], 1 }

</bundles_post_ra>
